<compile_context>
chip_gen: v7x
topology: tpu7x:2x2x1
jax: 0.10.0
libtpu: 0.0.40
codegen_flags: <defaults>
</compile_context>

<pallas_src>
import functools

import jax
import jax.numpy as jnp
from jax.experimental import pallas as pl
from jax.experimental.pallas import tpu as pltpu


_LANE = 128
_MASK_VALUE = -0.7 * float(jnp.finfo(jnp.float32).max)


def _round_up(n, m):
    return ((n + m - 1) // m) * m


def _vmem_capacity_bytes():
    """Per-core VMEM capacity; conservative fallback if the query fails."""
    try:
        return int(pltpu.get_tpu_info().vmem_capacity_bytes)
    except Exception:
        return 64 * 1024 * 1024  # v7x per-core size -> safe everywhere


def _pick_tile(n, candidates):
    for t in candidates:
        if t <= n and n % t == 0:
            return t
    return n


def _shrink_tile(n, cur):
    for t in (1024, 512, 256, 128):
        if t < cur and n % t == 0:
            return t
    return cur


# --------------------------------------------------------------------------
# Kernel 1: QKV projection, tiled over tokens (M) and output features (N).
# --------------------------------------------------------------------------
def _qkv_proj_kernel(x_ref, wq_ref, wk_ref, wv_ref, bq_ref, bk_ref, bv_ref,
                     q_ref, k_ref, v_ref, *, scale):
    x = x_ref[...].astype(jnp.bfloat16)                      # bf16 MXU operand
    q = jnp.dot(x, wq_ref[...], preferred_element_type=jnp.float32) + bq_ref[...]
    k = jnp.dot(x, wk_ref[...], preferred_element_type=jnp.float32) + bk_ref[...]
    v = jnp.dot(x, wv_ref[...], preferred_element_type=jnp.float32) + bv_ref[...]
    q_ref[...] = (q * scale).astype(q_ref.dtype)             # fold 1/sqrt(D) into q
    k_ref[...] = k.astype(k_ref.dtype)
    v_ref[...] = v.astype(v_ref.dtype)


# --------------------------------------------------------------------------
# Kernel 2: flash attention (online softmax), grid = (B, q_tiles, kv_tiles).
# --------------------------------------------------------------------------
def _online_softmax_step(q_ref, k_ref, v_ref, m_sc, l_sc, acc_sc,
                         *, seq_len, tk, mask_needed):
    kv = pl.program_id(2)

    @pl.when(kv == 0)
    def _():
        m_sc[...] = jnp.full_like(m_sc, -jnp.inf)
        l_sc[...] = jnp.zeros_like(l_sc)
        acc_sc[...] = jnp.zeros_like(acc_sc)

    # s = q @ k^T, contraction on the feature dim without an explicit transpose.
    # TODO(synk): inspect pl.lower_as_mlir for a per-step XLU transpose of the
    # k tile; if present, emit kT (D-major) from the QKV kernel instead.
    s = jax.lax.dot_general(q_ref[...], k_ref[...], (((1,), (1,)), ((), ())),
                            preferred_element_type=jnp.float32)   # (TQ, TK) f32

    if mask_needed:  # mask zero-padded key positions
        col = kv * tk + jax.lax.broadcasted_iota(jnp.int32, s.shape, 1)
        s = jnp.where(col < seq_len, s, _MASK_VALUE)

    m_prev = m_sc[...]
    m_new = jnp.maximum(m_prev, s.max(axis=-1, keepdims=True))
    alpha = jnp.exp(m_prev - m_new)
    # TODO(synk): on v6e/v7x a bf16 exp (p in bf16) ~doubles EUP throughput for
    # small D; kept f32 so the same kernel also runs well on v5e (no bf16 EUP).
    p = jnp.exp(s - m_new)
    l_sc[...] = alpha * l_sc[...] + p.sum(axis=-1, keepdims=True)
    acc_sc[...] = alpha * acc_sc[...] + jnp.dot(
        p.astype(v_ref.dtype), v_ref[...], preferred_element_type=jnp.float32)
    m_sc[...] = m_new


def _flash_attn_fused_kernel(q_ref, k_ref, v_ref, wout_ref, bout_ref, o_ref,
                             m_sc, l_sc, acc_sc, *, seq_len, tk, mask_needed):
    _online_softmax_step(q_ref, k_ref, v_ref, m_sc, l_sc, acc_sc,
                         seq_len=seq_len, tk=tk, mask_needed=mask_needed)

    @pl.when(pl.program_id(2) == pl.num_programs(2) - 1)
    def _():
        attn = acc_sc[...] * pl.reciprocal(l_sc[...], approx=True)
        y = jnp.dot(attn.astype(wout_ref.dtype), wout_ref[...],
                    preferred_element_type=jnp.float32) + bout_ref[...]
        o_ref[...] = y.astype(o_ref.dtype)


def _flash_attn_kernel(q_ref, k_ref, v_ref, o_ref, m_sc, l_sc, acc_sc,
                       *, seq_len, tk, mask_needed):
    _online_softmax_step(q_ref, k_ref, v_ref, m_sc, l_sc, acc_sc,
                         seq_len=seq_len, tk=tk, mask_needed=mask_needed)

    @pl.when(pl.program_id(2) == pl.num_programs(2) - 1)
    def _():
        o_ref[...] = (acc_sc[...] *
                      pl.reciprocal(l_sc[...], approx=True)).astype(o_ref.dtype)


# --------------------------------------------------------------------------
# Kernel 3: plain linear projection (used for out_proj when not fused).
# --------------------------------------------------------------------------
def _linear_kernel(x_ref, w_ref, b_ref, o_ref):
    y = jnp.dot(x_ref[...].astype(jnp.bfloat16), w_ref[...],
                preferred_element_type=jnp.float32) + b_ref[...]
    o_ref[...] = y.astype(o_ref.dtype)


# --------------------------------------------------------------------------
# Wrapper
# --------------------------------------------------------------------------
def self_attention(x, w_qkv, b_qkv, w_out, b_out):
    """x: (B, S, D) f32. w_qkv: (D, 3D), b_qkv: (1, 3D), w_out: (D, D), b_out: (1, D)."""
    B, S, D = x.shape
    scale = 1.0 / (D ** 0.5)                 # original d_model (matches torch)

    vmem_cap = _vmem_capacity_bytes()
    vmem_limit = vmem_cap * 3 // 4           # v7x: ~48 MiB, v5e/v6e: ~96 MiB
    big_vmem = vmem_cap >= 100 * 1024 * 1024
    tile_cands = (1024, 512, 256, 128) if big_vmem else (512, 256, 128)

    # Pad D and S to multiples of 128: lane-dense stores, >=128 MXU contraction,
    # and every tile (8,128)-aligned.  Zero padding keeps projections exact;
    # padded keys are masked in-kernel, padded rows/cols sliced off at the end.
    Dp = _round_up(D, _LANE)
    Sp = _round_up(S, _LANE)

    x_p = jnp.zeros((B, Sp, Dp), x.dtype).at[:, :S, :D].set(x)

    def pad_w(w):   # (D, D) -> (Dp, Dp) bf16
        return jnp.zeros((Dp, Dp), jnp.bfloat16).at[:D, :D].set(w.astype(jnp.bfloat16))

    def pad_b(b):   # (1, D) -> (1, Dp) f32
        return jnp.zeros((1, Dp), jnp.float32).at[:, :D].set(b.astype(jnp.float32))

    w_q = pad_w(w_qkv[:, 0 * D:1 * D]); b_q = pad_b(b_qkv[:, 0 * D:1 * D])
    w_k = pad_w(w_qkv[:, 1 * D:2 * D]); b_k = pad_b(b_qkv[:, 1 * D:2 * D])
    w_v = pad_w(w_qkv[:, 2 * D:3 * D]); b_v = pad_b(b_qkv[:, 2 * D:3 * D])
    w_o = pad_w(w_out);                 b_o = pad_b(b_out)

    # ---- QKV projection over flattened tokens, tiled in M and N ----
    M = B * Sp
    TM = _pick_tile(M, tile_cands)
    TN = _pick_tile(Dp, (512, 256, 128))

    def qkv_vmem(tm, tn):
        return (2 * tm * Dp * 4            # x (f32), double-buffered
                + 3 * 2 * Dp * tn * 2      # Wq/Wk/Wv (bf16), double-buffered
                + 3 * 2 * tn * 4           # biases
                + 3 * 2 * tm * tn * 2)     # q/k/v outputs (bf16), double-buffered

    while qkv_vmem(TM, TN) > vmem_limit * 6 // 10 and (TM > 128 or TN > 128):
        if TM >= TN and TM > 128:
            TM = _shrink_tile(M, TM)
        elif TN > 128:
            TN = _shrink_tile(Dp, TN)
        else:
            break

    x2d = x_p.reshape(M, Dp)
    qkv_cost = pl.CostEstimate(
        flops=2 * M * Dp * 3 * Dp,
        transcendentals=0,
        bytes_accessed=(Dp // TN) * 4 * M * Dp + 3 * 2 * Dp * Dp + 3 * 2 * M * Dp)

    q2d, k2d, v2d = pl.pallas_call(
        functools.partial(_qkv_proj_kernel, scale=scale),
        out_shape=(jax.ShapeDtypeStruct((M, Dp), jnp.bfloat16),) * 3,
        grid_spec=pltpu.PrefetchScalarGridSpec(
            num_scalar_prefetch=0,
            grid=(M // TM, Dp // TN),
            in_specs=[
                pl.BlockSpec((TM, Dp), lambda i, n: (i, 0)),     # x tokens
                pl.BlockSpec((Dp, TN), lambda i, n: (0, n)),     # Wq
                pl.BlockSpec((Dp, TN), lambda i, n: (0, n)),     # Wk
                pl.BlockSpec((Dp, TN), lambda i, n: (0, n)),     # Wv
                pl.BlockSpec((1, TN), lambda i, n: (0, n)),      # bq
                pl.BlockSpec((1, TN), lambda i, n: (0, n)),      # bk
                pl.BlockSpec((1, TN), lambda i, n: (0, n)),      # bv
            ],
            out_specs=(
                pl.BlockSpec((TM, TN), lambda i, n: (i, n)),
                pl.BlockSpec((TM, TN), lambda i, n: (i, n)),
                pl.BlockSpec((TM, TN), lambda i, n: (i, n)),
            ),
        ),
        compiler_params=pltpu.CompilerParams(
            dimension_semantics=("parallel", "parallel"),
            vmem_limit_bytes=vmem_limit),
        cost_estimate=qkv_cost,
    )(x2d, w_q, w_k, w_v, b_q, b_k, b_v)

    q = q2d.reshape(B, Sp, Dp)
    k = k2d.reshape(B, Sp, Dp)
    v = v2d.reshape(B, Sp, Dp)
    # TODO(synk): for HBM-bound small-D cases, fuse the K/V projection into the
    # attention kv loop to skip the k2d/v2d HBM round trip (gate on roofline).

    # ---- Flash attention (+ fused out_proj when Wout is cheap to hold) ----
    TQ = _pick_tile(Sp, tile_cands)
    TK = _pick_tile(Sp, tile_cands)

    # v7x megacore: keep B * (Sp // TQ) >= 2 so both TensorCores get work.
    while B * (Sp // TQ) < 2 and TQ > 128:
        TQ = _shrink_tile(Sp, TQ)

    fuse_out_proj = (Dp * Dp * 2) < vmem_limit // 6

    def flash_vmem(tq, tk):
        est = (2 * tq * Dp * 2              # q, double-buffered bf16
               + 2 * 2 * tk * Dp * 2        # k and v, double-buffered bf16
               + 2 * tq * Dp * 4            # output block, double-buffered
               + tq * Dp * 4 + 2 * tq * 4)  # acc / m / l scratch
        if fuse_out_proj:
            est += Dp * Dp * 2 + Dp * 4     # Wout + bout, single-buffered
        return est

    while flash_vmem(TQ, TK) > vmem_limit * 6 // 10 and (TQ > 128 or TK > 128):
        if TQ >= TK and TQ > 128:
            TQ = _shrink_tile(Sp, TQ)
        elif TK > 128:
            TK = _shrink_tile(Sp, TK)
        else:
            break

    mask_needed = (Sp != S)
    attn_cost = pl.CostEstimate(
        flops=4 * B * Sp * Sp * Dp + (2 * B * Sp * Dp * Dp if fuse_out_proj else 0),
        transcendentals=B * Sp * Sp,
        bytes_accessed=(2 * B * Sp * Dp                       # q
                        + (Sp // TQ) * 2 * 2 * B * Sp * Dp    # k/v re-read per q tile
                        + 2 * Dp * Dp + 4 * B * Sp * Dp))

    qkv_specs = [
        pl.BlockSpec((None, TQ, Dp), lambda b, qi, ki: (b, qi, 0)),   # q
        pl.BlockSpec((None, TK, Dp), lambda b, qi, ki: (b, ki, 0)),   # k
        pl.BlockSpec((None, TK, Dp), lambda b, qi, ki: (b, ki, 0)),   # v
    ]
    scratch = [pltpu.VMEM((TQ, 1), jnp.float32),   # running max m
               pltpu.VMEM((TQ, 1), jnp.float32),   # running denom l
               pltpu.VMEM((TQ, Dp), jnp.float32)]  # unnormalized output acc
    comp_params = pltpu.CompilerParams(
        dimension_semantics=("parallel", "parallel", "arbitrary"),
        vmem_limit_bytes=vmem_limit)

    if fuse_out_proj:
        y_p = pl.pallas_call(
            functools.partial(_flash_attn_fused_kernel, seq_len=S, tk=TK,
                              mask_needed=mask_needed),
            out_shape=jax.ShapeDtypeStruct((B, Sp, Dp), x.dtype),
            grid_spec=pltpu.PrefetchScalarGridSpec(
                num_scalar_prefetch=0,
                grid=(B, Sp // TQ, Sp // TK),
                in_specs=qkv_specs + [
                    # Constant index maps -> single-buffer the resident slabs.
                    pl.BlockSpec((Dp, Dp), lambda b, qi, ki: (0, 0),
                                 pipeline_mode=pl.Buffered(buffer_count=1)),
                    pl.BlockSpec((1, Dp), lambda b, qi, ki: (0, 0),
                                 pipeline_mode=pl.Buffered(buffer_count=1)),
                ],
                out_specs=pl.BlockSpec((None, TQ, Dp), lambda b, qi, ki: (b, qi, 0)),
                scratch_shapes=scratch,
            ),
            compiler_params=comp_params,
            cost_estimate=attn_cost,
        )(q, k, v, w_o, b_o)
    else:
        # Large d_model: keep Wout out of the flash kernel's VMEM budget; do
        # the output projection as a separate N-tiled matmul kernel.
        attn = pl.pallas_call(
            functools.partial(_flash_attn_kernel, seq_len=S, tk=TK,
                              mask_needed=mask_needed),
            out_shape=jax.ShapeDtypeStruct((B, Sp, Dp), jnp.bfloat16),
            grid_spec=pltpu.PrefetchScalarGridSpec(
                num_scalar_prefetch=0,
                grid=(B, Sp // TQ, Sp // TK),
                in_specs=qkv_specs,
                out_specs=pl.BlockSpec((None, TQ, Dp), lambda b, qi, ki: (b, qi, 0)),
                scratch_shapes=scratch,
            ),
            compiler_params=comp_params,
            cost_estimate=attn_cost,
        )(q, k, v)

        y2d = pl.pallas_call(
            _linear_kernel,
            out_shape=jax.ShapeDtypeStruct((M, Dp), x.dtype),
            grid_spec=pltpu.PrefetchScalarGridSpec(
                num_scalar_prefetch=0,
                grid=(M // TM, Dp // TN),
                in_specs=[
                    pl.BlockSpec((TM, Dp), lambda i, n: (i, 0)),
                    pl.BlockSpec((Dp, TN), lambda i, n: (0, n)),
                    pl.BlockSpec((1, TN), lambda i, n: (0, n)),
                ],
                out_specs=pl.BlockSpec((TM, TN), lambda i, n: (i, n)),
            ),
            compiler_params=pltpu.CompilerParams(
                dimension_semantics=("parallel", "parallel"),
                vmem_limit_bytes=vmem_limit),
        )(attn.reshape(M, Dp), w_o, b_o)
        y_p = y2d.reshape(B, Sp, Dp)

    return y_p[:, :S, :D]


def self_attention_ref(x, w_qkv, b_qkv, w_out, b_out):
    """Pure-JAX f32 reference mirroring the PyTorch forward (non-chunked path)."""
    D = x.shape[-1]
    qkv = x @ w_qkv + b_qkv[0]
    q, k, v = jnp.split(qkv, 3, axis=-1)
    scores = jnp.einsum("bqd,bkd->bqk", q, k) / (D ** 0.5)
    attn = jax.nn.softmax(scores, axis=-1)
    out = jnp.einsum("bqk,bkd->bqd", attn, v)
    return out @ w_out + b_out[0]


if __name__ == "__main__":
    # Small shapes consistent with the module's forward: (batch, seq, d_model)
    B, S, D = 2, 8, 32
    heads = 4  # stored-but-unused attribute in the reference module

    key = jax.random.PRNGKey(0)
    kx, k1, k2, k3, k4 = jax.random.split(key, 5)

    x = jax.random.normal(kx, (B, S, D), dtype=jnp.float32)
    w_qkv = jax.random.normal(k1, (D, 3 * D), dtype=jnp.float32) * (1.0 / (D ** 0.5))
    b_qkv = jax.random.normal(k2, (1, 3 * D), dtype=jnp.float32) * 0.01
    w_out = jax.random.normal(k3, (D, D), dtype=jnp.float32) * (1.0 / (D ** 0.5))
    b_out = jax.random.normal(k4, (1, D), dtype=jnp.float32) * 0.01

    y = self_attention(x, w_qkv, b_qkv, w_out, b_out)
    y = jax.block_until_ready(y)

    y_ref = self_attention_ref(x, w_qkv, b_qkv, w_out, b_out)
    # bf16 MXU operands (f32 accumulation) + approx reciprocal -> tolerance
    # reflects bf16 rounding; structure/semantics match the f32 reference.
    assert jnp.allclose(y, y_ref, atol=5e-2, rtol=5e-2), "mismatch vs reference"

    print("KERNEL_OK")
</pallas_src>

<mosaic_0001>
module attributes {stable_mosaic.version = 11 : i64} {
  func.func @_qkv_proj_kernel(%arg0: i32, %arg1: i32, %arg2: memref<256x128xf32, #tpu.memory_space<vmem>>, %arg3: memref<128x128xbf16, #tpu.memory_space<vmem>>, %arg4: memref<128x128xbf16, #tpu.memory_space<vmem>>, %arg5: memref<128x128xbf16, #tpu.memory_space<vmem>>, %arg6: memref<1x128xf32, #tpu.memory_space<vmem>>, %arg7: memref<1x128xf32, #tpu.memory_space<vmem>>, %arg8: memref<1x128xf32, #tpu.memory_space<vmem>>, %arg9: memref<256x128xbf16, #tpu.memory_space<vmem>>, %arg10: memref<256x128xbf16, #tpu.memory_space<vmem>>, %arg11: memref<256x128xbf16, #tpu.memory_space<vmem>>) attributes {dimension_semantics = [#tpu.dimension_semantics<parallel>, #tpu.dimension_semantics<parallel>], iteration_bounds = array<i64: 1, 1>, scalar_prefetch = 0 : i64, scratch_operands = 0 : i64, tpu.core_type = #tpu.core_type<tc>, window_params = [{transform_indices = @transform_0, window_bounds = array<i64: 256, 128>}, {transform_indices = @transform_1, window_bounds = array<i64: 128, 128>}, {transform_indices = @transform_2, window_bounds = array<i64: 128, 128>}, {transform_indices = @transform_3, window_bounds = array<i64: 128, 128>}, {transform_indices = @transform_4, window_bounds = array<i64: 1, 128>}, {transform_indices = @transform_5, window_bounds = array<i64: 1, 128>}, {transform_indices = @transform_6, window_bounds = array<i64: 1, 128>}, {transform_indices = @transform_7, window_bounds = array<i64: 256, 128>}, {transform_indices = @transform_8, window_bounds = array<i64: 256, 128>}, {transform_indices = @transform_9, window_bounds = array<i64: 256, 128>}]} {
    %c0 = arith.constant 0 : index
    %c0_0 = arith.constant 0 : index
    %0 = vector.load %arg2[%c0, %c0_0] : memref<256x128xf32, #tpu.memory_space<vmem>>, vector<256x128xf32>
    %1 = arith.truncf %0 : vector<256x128xf32> to vector<256x128xbf16>
    %c0_1 = arith.constant 0 : index
    %c0_2 = arith.constant 0 : index
    %2 = vector.load %arg3[%c0_1, %c0_2] : memref<128x128xbf16, #tpu.memory_space<vmem>>, vector<128x128xbf16>
    %cst = arith.constant dense<0.000000e+00> : vector<256x128xf32>
    %3 = tpu.matmul %1, %2, %cst {dimension_numbers = #tpu.dot_dimension_numbers<[1], [0], [0], [1], [0, 0, 1, 1], [], []>} : vector<256x128xbf16>, vector<128x128xbf16>, vector<256x128xf32> -> vector<256x128xf32>
    %c0_3 = arith.constant 0 : index
    %c0_4 = arith.constant 0 : index
    %4 = vector.load %arg6[%c0_3, %c0_4] : memref<1x128xf32, #tpu.memory_space<vmem>>, vector<1x128xf32>
    %5 = vector.broadcast %4 : vector<1x128xf32> to vector<256x128xf32>
    %6 = arith.addf %3, %5 : vector<256x128xf32>
    %c0_5 = arith.constant 0 : index
    %c0_6 = arith.constant 0 : index
    %7 = vector.load %arg4[%c0_5, %c0_6] : memref<128x128xbf16, #tpu.memory_space<vmem>>, vector<128x128xbf16>
    %cst_7 = arith.constant dense<0.000000e+00> : vector<256x128xf32>
    %8 = tpu.matmul %1, %7, %cst_7 {dimension_numbers = #tpu.dot_dimension_numbers<[1], [0], [0], [1], [0, 0, 1, 1], [], []>} : vector<256x128xbf16>, vector<128x128xbf16>, vector<256x128xf32> -> vector<256x128xf32>
    %c0_8 = arith.constant 0 : index
    %c0_9 = arith.constant 0 : index
    %9 = vector.load %arg7[%c0_8, %c0_9] : memref<1x128xf32, #tpu.memory_space<vmem>>, vector<1x128xf32>
    %10 = vector.broadcast %9 : vector<1x128xf32> to vector<256x128xf32>
    %11 = arith.addf %8, %10 : vector<256x128xf32>
    %c0_10 = arith.constant 0 : index
    %c0_11 = arith.constant 0 : index
    %12 = vector.load %arg5[%c0_10, %c0_11] : memref<128x128xbf16, #tpu.memory_space<vmem>>, vector<128x128xbf16>
    %cst_12 = arith.constant dense<0.000000e+00> : vector<256x128xf32>
    %13 = tpu.matmul %1, %12, %cst_12 {dimension_numbers = #tpu.dot_dimension_numbers<[1], [0], [0], [1], [0, 0, 1, 1], [], []>} : vector<256x128xbf16>, vector<128x128xbf16>, vector<256x128xf32> -> vector<256x128xf32>
    %c0_13 = arith.constant 0 : index
    %c0_14 = arith.constant 0 : index
    %14 = vector.load %arg8[%c0_13, %c0_14] : memref<1x128xf32, #tpu.memory_space<vmem>>, vector<1x128xf32>
    %15 = vector.broadcast %14 : vector<1x128xf32> to vector<256x128xf32>
    %16 = arith.addf %13, %15 : vector<256x128xf32>
    %cst_15 = arith.constant 0.176776692 : f32
    %17 = vector.broadcast %cst_15 : f32 to vector<256x128xf32>
    %18 = arith.mulf %6, %17 : vector<256x128xf32>
    %19 = arith.truncf %18 : vector<256x128xf32> to vector<256x128xbf16>
    %c0_16 = arith.constant 0 : index
    %c0_17 = arith.constant 0 : index
    %20 = vector.load %arg9[%c0_16, %c0_17] : memref<256x128xbf16, #tpu.memory_space<vmem>>, vector<256x128xbf16>
    tpu.vector_store %arg9[%c0_16, %c0_17], %19 {strides = array<i32>} : memref<256x128xbf16, #tpu.memory_space<vmem>>, vector<256x128xbf16>,
    %21 = arith.truncf %11 : vector<256x128xf32> to vector<256x128xbf16>
    %c0_18 = arith.constant 0 : index
    %c0_19 = arith.constant 0 : index
    %22 = vector.load %arg10[%c0_18, %c0_19] : memref<256x128xbf16, #tpu.memory_space<vmem>>, vector<256x128xbf16>
    tpu.vector_store %arg10[%c0_18, %c0_19], %21 {strides = array<i32>} : memref<256x128xbf16, #tpu.memory_space<vmem>>, vector<256x128xbf16>,
    %23 = arith.truncf %16 : vector<256x128xf32> to vector<256x128xbf16>
    %c0_20 = arith.constant 0 : index
    %c0_21 = arith.constant 0 : index
    %24 = vector.load %arg11[%c0_20, %c0_21] : memref<256x128xbf16, #tpu.memory_space<vmem>>, vector<256x128xbf16>
    tpu.vector_store %arg11[%c0_20, %c0_21], %23 {strides = array<i32>} : memref<256x128xbf16, #tpu.memory_space<vmem>>, vector<256x128xbf16>,
    return
  }
  func.func @transform_0(%arg0: i32, %arg1: i32) -> (i32, i32) {
    %c0_i32 = arith.constant 0 : i32
    %c0_i32_0 = arith.constant 0 : i32
    return %arg0, %c0_i32 : i32, i32
  }
  func.func @transform_1(%arg0: i32, %arg1: i32) -> (i32, i32) {
    %c0_i32 = arith.constant 0 : i32
    %c0_i32_0 = arith.constant 0 : i32
    return %c0_i32, %arg1 : i32, i32
  }
  func.func @transform_2(%arg0: i32, %arg1: i32) -> (i32, i32) {
    %c0_i32 = arith.constant 0 : i32
    %c0_i32_0 = arith.constant 0 : i32
    return %c0_i32, %arg1 : i32, i32
  }
  func.func @transform_3(%arg0: i32, %arg1: i32) -> (i32, i32) {
    %c0_i32 = arith.constant 0 : i32
    %c0_i32_0 = arith.constant 0 : i32
    return %c0_i32, %arg1 : i32, i32
  }
  func.func @transform_4(%arg0: i32, %arg1: i32) -> (i32, i32) {
    %c0_i32 = arith.constant 0 : i32
    %c0_i32_0 = arith.constant 0 : i32
    return %c0_i32, %arg1 : i32, i32
  }
  func.func @transform_5(%arg0: i32, %arg1: i32) -> (i32, i32) {
    %c0_i32 = arith.constant 0 : i32
    %c0_i32_0 = arith.constant 0 : i32
    return %c0_i32, %arg1 : i32, i32
  }
  func.func @transform_6(%arg0: i32, %arg1: i32) -> (i32, i32) {
    %c0_i32 = arith.constant 0 : i32
    %c0_i32_0 = arith.constant 0 : i32
    return %c0_i32, %arg1 : i32, i32
  }
  func.func @transform_7(%arg0: i32, %arg1: i32) -> (i32, i32) {
    %c0_i32 = arith.constant 0 : i32
    return %arg0, %arg1 : i32, i32
  }
  func.func @transform_8(%arg0: i32, %arg1: i32) -> (i32, i32) {
    %c0_i32 = arith.constant 0 : i32
    return %arg0, %arg1 : i32, i32
  }
  func.func @transform_9(%arg0: i32, %arg1: i32) -> (i32, i32) {
    %c0_i32 = arith.constant 0 : i32
    return %arg0, %arg1 : i32, i32
  }
}

</mosaic_0001>

<bundles_post_ra>
// kernel: tpu_custom_call.1
= control target key start
LH: loop header
LB: loop body
LE: loop exit
PB: predicated region body
PF: predicated region fallthrough
CT: control target
= control target key end

     0   :  { %15 = vsyncpa [#allocation3], 0  ;;  %s2678_s0 = inlined_call_operand.hbm [shape: f32[256,128], index: 0, kind: input, shape index: {}]   ;;  %s2679_s1 = inlined_call_operand.hbm [shape: bf16[128,128], index: 1, kind: input, shape index: {}]   ;;  %s2680_s2 = inlined_call_operand.hbm [shape: bf16[128,128], index: 2, kind: input, shape index: {}]   ;;  %s2681_s3 = inlined_call_operand.hbm [shape: bf16[128,128], index: 3, kind: input, shape index: {}]   ;;  %s2682_s4 = inlined_call_operand.vmem [shape: f32[1,128], index: 4, kind: input, shape index: {}]   ;;  %s2683_s5 = inlined_call_operand.vmem [shape: f32[1,128], index: 5, kind: input, shape index: {}]   ;;  %s2684_s6 = inlined_call_operand.vmem [shape: f32[1,128], index: 6, kind: input, shape index: {}]   ;;  %s2685_s7 = inlined_call_operand.hbm [shape: bf16[256,128], index: 7, kind: output, shape index: {0}]   ;;  %s2686_s8 = inlined_call_operand.hbm [shape: bf16[256,128], index: 8, kind: output, shape index: {1}]   ;;  %s2687_s9 = inlined_call_operand.hbm [shape: bf16[256,128], index: 9, kind: output, shape index: {2}]  }
   0x1   :  { %16 = vsyncpa [#allocation6], 0 }
   0x2   :  { %17 = vsyncpa [#allocation9], 0 }
   0x3   :  { %18 = vsyncpa [#allocation4], 0 }
   0x4   :  { %19 = vsyncpa [#allocation12], 0  ;;  %s2328_s30 = smov [#allocation5]   ;;  %s2164_s13 = scalar_lea.hbm %s2679_s1, 1024 }
   0x5   :  { %s37_s10 = sshll.u32 %s2328_s30, 4  ;;  %p2165_p0 = scmp.ne.s32.totalorder %s2679_s1, %s2164_s13  ;;  %s38_s10 = int_to_ptr.vmem [resolvable:$true] %s37_s10 }
   0x6   :  { %p2168_p1 = scmp.lt.u32.totalorder %s2164_s13, %s2679_s1 }
   0x8   :  { %p2170_p2 = pnand %p2168_p1, %p2165_p0 }
   0xa   :  { %2173 = shalt.err (!%p2170_p2)
}
   0xb   :  { %s2174_s18 = scalar_lea.vmem %s38_s10, 1024  ;;  %p2179_p4 = scmp.lt.s32.totalorder %s38_s10, %s38_s10 }
   0xc   :  { %p2175_p3 = scmp.ne.s32.totalorder %s38_s10, %s2174_s18  ;;  %p2180_p5 = scmp.lt.s32.totalorder %s2174_s18, %s2174_s18 }
   0xe   :  { %p2181_p6 = por %p2180_p5, %p2179_p4 }
  0x10   :  { %p2182_p7 = pnand %p2181_p6, %p2175_p3 }
  0x12   :  { %2185 = shalt.err (!%p2182_p7)
}
  0x13   :  { %s2329_s19 = smov 64   ;;  %s2330_s20 = smov 4  }
  0x14   :  { %43 = dma.hbm_to_vmem [thread:$0]  %s2679_s1, 1024, %s38_s10, [#allocation6], %s2329_s19, %s2329_s19, %s2330_s20  }
  0x15   :  { %s2331_s23 = smov [#allocation2]   ;;  %s2186_s27 = scalar_lea.hbm %s2678_s0, 4096 }
  0x16   :  { %s25_s24 = sshll.u32 %s2331_s23, 4  ;;  %p2187_p8 = scmp.ne.s32.totalorder %s2678_s0, %s2186_s27  ;;  %s26_s24 = int_to_ptr.vmem [resolvable:$true] %s25_s24 }
  0x17   :  { %p2190_p9 = scmp.lt.u32.totalorder %s2186_s27, %s2678_s0 }
  0x19   :  { %p2192_p10 = pnand %p2190_p9, %p2187_p8 }
  0x1b   :  { %2195 = shalt.err (!%p2192_p10)
}
  0x1c   :  { %s2196_s12 = scalar_lea.vmem %s26_s24, 4096  ;;  %p2201_p12 = scmp.lt.s32.totalorder %s26_s24, %s26_s24 }
  0x1d   :  { %p2197_p11 = scmp.ne.s32.totalorder %s26_s24, %s2196_s12  ;;  %p2202_p13 = scmp.lt.s32.totalorder %s2196_s12, %s2196_s12 }
  0x1f   :  { %p2203_p0 = por %p2202_p13, %p2201_p12 }
  0x21   :  { %p2204_p1 = pnand %p2203_p0, %p2197_p11 }
  0x23   :  { %2207 = shalt.err (!%p2204_p1)
}
  0x24   :  { %s2332_s1 = smov 128   ;;  %s2333_s10 = smov 8  }
  0x25   :  { %31 = dma.hbm_to_vmem [thread:$0]  %s2678_s0, 4096, %s26_s24, [#allocation3], %s2332_s1, %s2332_s1, %s2333_s10  }
  0x26   :  { %s2334_s15 = smov [#allocation7]   ;;  %s2335_s17 = smov [#allocation8]  }
  0x27   :  { %s49_s16 = sshll.u32 %s2334_s15, 4  ;;  %s61_s18 = sshll.u32 %s2335_s17, 4  ;;  %s50_s16 = int_to_ptr.vmem [resolvable:$true] %s49_s16  ;;  %s2416_s18 = int_to_ptr.vmem [resolvable:$true] %s61_s18 }
  0x28   :  { %s2208_s23 = scalar_lea.hbm %s2680_s2, 1024 }
  0x29   :  { %p2209_p2 = scmp.ne.s32.totalorder %s2680_s2, %s2208_s23  ;;  %p2212_p3 = scmp.lt.u32.totalorder %s2208_s23, %s2680_s2 }
  0x2b   :  { %p2214_p4 = pnand %p2212_p3, %p2209_p2 }
  0x2d   :  { %2217 = shalt.err (!%p2214_p4)
}
  0x2e   :  { %s2218_s0 = scalar_lea.vmem %s50_s16, 1024  ;;  %p2223_p6 = scmp.lt.s32.totalorder %s50_s16, %s50_s16 }
  0x2f   :  { %p2219_p5 = scmp.ne.s32.totalorder %s50_s16, %s2218_s0  ;;  %p2224_p7 = scmp.lt.s32.totalorder %s2218_s0, %s2218_s0 }
  0x31   :  { %p2225_p8 = por %p2224_p7, %p2223_p6 }
  0x33   :  { %p2226_p9 = pnand %p2225_p8, %p2219_p5 }
  0x35   :  { %2229 = shalt.err (!%p2226_p9)
}
  0x36   :  { %55 = dma.hbm_to_vmem [thread:$0]  %s2680_s2, 1024, %s50_s16, [#allocation6], %s2329_s19, %s2329_s19, %s2330_s20  }
  0x37   :  { %s2230_s12 = scalar_lea.hbm %s2681_s3, 1024 }
  0x38   :  { %p2231_p10 = scmp.ne.s32.totalorder %s2681_s3, %s2230_s12  ;;  %p2234_p11 = scmp.lt.u32.totalorder %s2230_s12, %s2681_s3 }
  0x3a   :  { %p2236_p12 = pnand %p2234_p11, %p2231_p10 }
  0x3c   :  { %2239 = shalt.err (!%p2236_p12)
}
  0x3d   :  { %s2240_s15 = scalar_lea.vmem %s2416_s18, 1024  ;;  %p2245_p0 = scmp.lt.s32.totalorder %s2416_s18, %s2416_s18 }
  0x3e   :  { %p2241_p13 = scmp.ne.s32.totalorder %s2416_s18, %s2240_s15  ;;  %p2246_p1 = scmp.lt.s32.totalorder %s2240_s15, %s2240_s15 }
  0x40   :  { %p2247_p2 = por %p2246_p1, %p2245_p0 }
  0x42   :  { %p2248_p3 = pnand %p2247_p2, %p2241_p13 }
  0x44   :  { %2251 = shalt.err (!%p2248_p3)
}
  0x45   :  { %67 = dma.hbm_to_vmem [thread:$0]  %s2681_s3, 1024, %s2416_s18, [#allocation9], %s2329_s19, %s2329_s19, %s2330_s20  }
  0x46   :  { %2318 = dma.done.wait [#allocation3], 4096  }
  0x47   :  { %2319 = vsyncadd [#allocation3], 4294963200 }
  0x48   :  { %2320 = dma.done.wait [#allocation6], 2048  }
  0x49   :  { %2321 = vsyncadd [#allocation6], 4294965248 }
  0x4a   :  { %2322 = dma.done.wait [#allocation9], 1024  }
  0x4b   :  { %2323 = vsyncadd [#allocation9], 4294966272  ;;  %v2140_v0 = vld [vmem:[#allocation5] sm:$0xff]   ;;  %v2141_v1 = vld [vmem:[#allocation5 + $0x8] sm:$0xff]   ;;  %s2336_s21 = smov [#allocation10]  }
  0x4c   :  { %1969 = vmatprep.subr.bf16.mxu0 %v2140_v0  ;;  %2113 = vmatprep.subr.bf16.mxu1 %v2140_v0  ;;  %v2142_v2 = vld [vmem:[#allocation5 + $0x10] sm:$0xff]   ;;  %v2143_v3 = vld [vmem:[#allocation5 + $0x18] sm:$0xff]   ;;  %v87_v4 = vld [vmem:[#allocation2] sm:$0xff]  ;;  %s1348_s22 = sshll.u32 %s2336_s21, 4  ;;  %s2555_s22 = int_to_ptr.vmem [resolvable:$true] %s1348_s22 }
  0x4d   :  { %1970 = vmatpush3.bf16.msra.mxu0 %v2140_v0  ;;  %2121 = vmatpush3.bf16.msra.mxu1 %v2140_v0  ;;  %v88_v5 = vld [vmem:[#allocation2 + $0x8] sm:$0xff]  ;;  %v103_v6 = vld [vmem:[#allocation2 + $0x80] sm:$0xff]  ;;  %v2146_v12 = vld [vmem:[#allocation5 + $0x30] sm:$0xff]   ;;  %p2257_p5 = scmp.lt.s32.totalorder %s2555_s22, %s2555_s22 }
  0x4e   :  { %1971 = vmatprep.subr.bf16.mxu0 %v2141_v1  ;;  %2114 = vmatprep.subr.bf16.mxu1 %v2141_v1  ;;  %v2453_v7 = vpack.c.bf16 %v88_v5, %v87_v4  ;;  %v104_v8 = vld [vmem:[#allocation2 + $0x88] sm:$0xff]  ;;  %v2144_v10 = vld [vmem:[#allocation5 + $0x20] sm:$0xff]   ;;  %v2147_v13 = vld [vmem:[#allocation5 + $0x38] sm:$0xff]  }
  0x4f   :  { %v2455_v9 = vpack.c.bf16 %v104_v8, %v103_v6  ;;  %v2145_v11 = vld [vmem:[#allocation5 + $0x28] sm:$0xff]   ;;  %v89_v14 = vld [vmem:[#allocation2 + $0x10] sm:$0xff]  ;;  %v90_v15 = vld [vmem:[#allocation2 + $0x18] sm:$0xff] }
  0x50   :  { %1985 = vmatprep.mubr.bf16.mxu0 %v2453_v7  ;;  %v105_v16 = vld [vmem:[#allocation2 + $0x90] sm:$0xff]  ;;  %v106_v17 = vld [vmem:[#allocation2 + $0x98] sm:$0xff]  ;;  %v2148_v18 = vld [vmem:[#allocation7] sm:$0xff]   ;;  %v2459_v22 = vpack.c.bf16 %v90_v15, %v89_v14 }
  0x51   :  { %1972 = vmatpush3.bf16.msra.mxu0 %v2141_v1  ;;  %2122 = vmatpush3.bf16.msra.mxu1 %v2141_v1  ;;  %v2149_v19 = vld [vmem:[#allocation8] sm:$0xff]   ;;  %v92_v21 = vld [vmem:[#allocation2 + $0x28] sm:$0xff]  ;;  %v2461_v23 = vpack.c.bf16 %v106_v17, %v105_v16  ;;  %v93_v30 = vld [vmem:[#allocation2 + $0x30] sm:$0xff] }
  0x52   :  { %1973 = vmatprep.subr.bf16.mxu0 %v2142_v2  ;;  %2115 = vmatprep.subr.bf16.mxu1 %v2142_v2  ;;  %v91_v20 = vld [vmem:[#allocation2 + $0x20] sm:$0xff]  ;;  %v108_v25 = vld [vmem:[#allocation2 + $0xa8] sm:$0xff]  ;;  %v94_v31 = vld [vmem:[#allocation2 + $0x38] sm:$0xff] }
  0x53   :  { %2001 = vmatprep.mubr.bf16.mxu1 %v2455_v9  ;;  %v107_v24 = vld [vmem:[#allocation2 + $0xa0] sm:$0xff]  ;;  %v2150_v26 = vld [vmem:[#allocation7 + $0x8] sm:$0xff]   ;;  %v2463_v28 = vpack.c.bf16 %v92_v21, %v91_v20  ;;  %v109_v32 = vld [vmem:[#allocation2 + $0xb0] sm:$0xff]  ;;  %v2471_v37 = vpack.c.bf16 %v94_v31, %v93_v30 }
  0x54   :  { %v2151_v27 = vld [vmem:[#allocation8 + $0x8] sm:$0xff]   ;;  %v2465_v29 = vpack.c.bf16 %v108_v25, %v107_v24  ;;  %v110_v33 = vld [vmem:[#allocation2 + $0xb8] sm:$0xff]  ;;  %v2152_v34 = vld [vmem:[#allocation7 + $0x10] sm:$0xff]  }
  0x55   :  { %1974 = vmatpush3.bf16.msra.mxu0 %v2142_v2  ;;  %2123 = vmatpush3.bf16.msra.mxu1 %v2142_v2  ;;  %v2153_v35 = vld [vmem:[#allocation8 + $0x10] sm:$0xff]   ;;  %v95_v36 = vld [vmem:[#allocation2 + $0x40] sm:$0xff]  ;;  %v2473_v38 = vpack.c.bf16 %v110_v33, %v109_v32  ;;  %v96_v39 = vld [vmem:[#allocation2 + $0x48] sm:$0xff] }
  0x56   :  { %1975 = vmatprep.subr.bf16.mxu0 %v2143_v3  ;;  %2116 = vmatprep.subr.bf16.mxu1 %v2143_v3  ;;  %v111_v40 = vld [vmem:[#allocation2 + $0xc0] sm:$0xff]  ;;  %v112_v41 = vld [vmem:[#allocation2 + $0xc8] sm:$0xff]  ;;  %v2154_v42 = vld [vmem:[#allocation7 + $0x18] sm:$0xff]   ;;  %v2475_v44 = vpack.c.bf16 %v96_v39, %v95_v36 }
  0x57   :  { %v2155_v43 = vld [vmem:[#allocation8 + $0x18] sm:$0xff]   ;;  %v2477_v45 = vpack.c.bf16 %v112_v41, %v111_v40  ;;  %v97_v46 = vld [vmem:[#allocation2 + $0x50] sm:$0xff]  ;;  %v2156_v50 = vld [vmem:[#allocation7 + $0x20] sm:$0xff]  }
  0x58   :  { %v98_v47 = vld [vmem:[#allocation2 + $0x58] sm:$0xff]  ;;  %v113_v48 = vld [vmem:[#allocation2 + $0xd0] sm:$0xff]  ;;  %v2157_v51 = vld [vmem:[#allocation8 + $0x20] sm:$0xff]  }
  0x59   :  { %1976 = vmatpush3.bf16.msra.mxu0 %v2143_v3  ;;  %2124 = vmatpush3.bf16.msra.mxu1 %v2143_v3  ;;  %v114_v49 = vld [vmem:[#allocation2 + $0xd8] sm:$0xff]  ;;  %v99_v52 = vld [vmem:[#allocation2 + $0x60] sm:$0xff]  ;;  %v124_v53 = vpack.c.bf16 %v98_v47, %v97_v46  ;;  %v100_v55 = vld [vmem:[#allocation2 + $0x68] sm:$0xff] }
  0x5a   :  { %1977 = vmatprep.subr.bf16.mxu0 %v2144_v10  ;;  %2117 = vmatprep.subr.bf16.mxu1 %v2144_v10  ;;  %v2483_v54 = vpack.c.bf16 %v114_v49, %v113_v48  ;;  %v115_v56 = vld [vmem:[#allocation2 + $0xe0] sm:$0xff]  ;;  %v116_v57 = vld [vmem:[#allocation2 + $0xe8] sm:$0xff]  ;;  %v125_v60 = vpack.c.bf16 %v100_v55, %v99_v52  ;;  %v101_v62 = vld [vmem:[#allocation2 + $0x70] sm:$0xff] }
  0x5b   :  { %v2158_v58 = vld [vmem:[#allocation7 + $0x28] sm:$0xff]   ;;  %v133_v61 = vpack.c.bf16 %v116_v57, %v115_v56  ;;  %v102_v63 = vld [vmem:[#allocation2 + $0x78] sm:$0xff]  ;;  %v117_v0 = vld [vmem:[#allocation2 + $0xf0] sm:$0xff] }
  0x5c   :  { %v2159_v59 = vld [vmem:[#allocation8 + $0x28] sm:$0xff]   ;;  %v118_v1 = vld [vmem:[#allocation2 + $0xf8] sm:$0xff]  ;;  %v2160_v2 = vld [vmem:[#allocation7 + $0x30] sm:$0xff]   ;;  %v126_v4 = vpack.c.bf16 %v102_v63, %v101_v62 }
  0x5d   :  { %1978 = vmatpush3.bf16.msra.mxu0 %v2144_v10  ;;  %2125 = vmatpush3.bf16.msra.mxu1 %v2144_v10  ;;  %v2161_v3 = vld [vmem:[#allocation8 + $0x30] sm:$0xff]   ;;  %v134_v5 = vpack.c.bf16 %v118_v1, %v117_v0  ;;  %v2162_v6 = vld [vmem:[#allocation7 + $0x38] sm:$0xff]  }
  0x5e   :  { %1979 = vmatprep.subr.bf16.mxu0 %v2145_v11  ;;  %2118 = vmatprep.subr.bf16.mxu1 %v2145_v11  ;;  %v2163_v8 = vld [vmem:[#allocation8 + $0x38] sm:$0xff]  }
  0x61   :  { %1980 = vmatpush3.bf16.msra.mxu0 %v2145_v11  ;;  %2126 = vmatpush3.bf16.msra.mxu1 %v2145_v11 }
  0x62   :  { %1981 = vmatprep.subr.bf16.mxu0 %v2146_v12  ;;  %2119 = vmatprep.subr.bf16.mxu1 %v2146_v12 }
  0x65   :  { %1982 = vmatpush3.bf16.msra.mxu0 %v2146_v12  ;;  %2127 = vmatpush3.bf16.msra.mxu1 %v2146_v12 }
  0x66   :  { %1983 = vmatprep.subr.bf16.mxu0 %v2147_v13  ;;  %2120 = vmatprep.subr.bf16.mxu1 %v2147_v13 }
  0x69   :  { %1984 = vmatpush3.bf16.msra.mxu0 %v2147_v13  ;;  %2128 = vmatpush3.bf16.msra.mxu1 %v2147_v13 }
  0x6a   :  { %2017 = vmatprep.subr.bf16.mxu1 %v2148_v18  ;;  %2065 = vmatprep.subr.bf16.mxu0 %v2149_v19 }
  0x6c   :  { %1986 = vmatmul.mubr.bf16.vlgmr.msra.gmra.mrb[0].mxu0 %v2459_v22  ;;  %2002 = vmatmul.mubr.bf16.vlgmr.msra.gmra.mrb[0].mxu1 %v2461_v23 }
  0x6d   :  { %2018 = vmatpush3.bf16.msra.mxu1 %v2148_v18  ;;  %2066 = vmatpush3.bf16.msra.mxu0 %v2149_v19 }
  0x6e   :  { %2019 = vmatprep.subr.bf16.mxu1 %v2150_v26  ;;  %2067 = vmatprep.subr.bf16.mxu0 %v2151_v27 }
  0x6f   :  { %1989 = vmatprep.mubr.bf16.mxu0 %v2463_v28  ;;  %2005 = vmatprep.mubr.bf16.mxu1 %v2465_v29 }
  0x71   :  { %2020 = vmatpush3.bf16.msra.mxu1 %v2150_v26  ;;  %2068 = vmatpush3.bf16.msra.mxu0 %v2151_v27 }
  0x72   :  { %2021 = vmatprep.subr.bf16.mxu1 %v2152_v34  ;;  %2069 = vmatprep.subr.bf16.mxu0 %v2153_v35 }
  0x74   :  { %1990 = vmatmul.mubr.bf16.gmra.mrb[4].mxu0 %v2471_v37  ;;  %2006 = vmatmul.mubr.bf16.gmra.mrb[4].mxu1 %v2473_v38 }
  0x75   :  { %2022 = vmatpush3.bf16.msra.mxu1 %v2152_v34  ;;  %2070 = vmatpush3.bf16.msra.mxu0 %v2153_v35 }
  0x76   :  { %2023 = vmatprep.subr.bf16.mxu1 %v2154_v42  ;;  %2071 = vmatprep.subr.bf16.mxu0 %v2155_v43 }
  0x77   :  { %1993 = vmatprep.mubr.bf16.mxu0 %v2475_v44  ;;  %2009 = vmatprep.mubr.bf16.mxu1 %v2477_v45 }
  0x79   :  { %2024 = vmatpush3.bf16.msra.mxu1 %v2154_v42  ;;  %2072 = vmatpush3.bf16.msra.mxu0 %v2155_v43 }
  0x7a   :  { %2025 = vmatprep.subr.bf16.mxu1 %v2156_v50  ;;  %2073 = vmatprep.subr.bf16.mxu0 %v2157_v51 }
  0x7c   :  { %1994 = vmatmul.mubr.bf16.gmra.mrb[8].mxu0 %v124_v53  ;;  %2010 = vmatmul.mubr.bf16.gmra.mrb[8].mxu1 %v2483_v54 }
  0x7d   :  { %2026 = vmatpush3.bf16.msra.mxu1 %v2156_v50  ;;  %2074 = vmatpush3.bf16.msra.mxu0 %v2157_v51 }
  0x7e   :  { %2027 = vmatprep.subr.bf16.mxu1 %v2158_v58  ;;  %2075 = vmatprep.subr.bf16.mxu0 %v2159_v59 }
  0x7f   :  { %1997 = vmatprep.mubr.bf16.mxu0 %v125_v60  ;;  %2013 = vmatprep.mubr.bf16.mxu1 %v133_v61 }
  0x81   :  { %2028 = vmatpush3.bf16.msra.mxu1 %v2158_v58  ;;  %2076 = vmatpush3.bf16.msra.mxu0 %v2159_v59 }
  0x82   :  { %2029 = vmatprep.subr.bf16.mxu1 %v2160_v2  ;;  %2077 = vmatprep.subr.bf16.mxu0 %v2161_v3 }
  0x84   :  { %1998 = vmatmul.mubr.bf16.gmra.mrb[12].mxu0 %v126_v4  ;;  %2014 = vmatmul.mubr.bf16.gmra.mrb[12].mxu1 %v134_v5 }
  0x85   :  { %2030 = vmatpush3.bf16.msra.mxu1 %v2160_v2  ;;  %2078 = vmatpush3.bf16.msra.mxu0 %v2161_v3 }
  0x86   :  { %2031 = vmatprep.subr.bf16.mxu1 %v2162_v6  ;;  %2079 = vmatprep.subr.bf16.mxu0 %v2163_v8 }
  0x87   :  { %2033 = vmatprep.mubr.bf16.mxu1 %v2453_v7  ;;  %2081 = vmatprep.mubr.bf16.mxu0 %v2453_v7  ;;  %v2511_v7 = vld [vmem:[%s2682_s4] ss:$0 sm:$0xff] }
  0x89   :  { %2032 = vmatpush3.bf16.msra.mxu1 %v2162_v6  ;;  %2080 = vmatpush3.bf16.msra.mxu0 %v2163_v8 }
  0x8c   :  { %2034 = vmatmul.mubr.bf16.vlgmr.msra.gmra.mrb[16].mxu1 %v2459_v22  ;;  %2082 = vmatmul.mubr.bf16.vlgmr.msra.gmra.mrb[16].mxu0 %v2459_v22 }
  0x8d   :  { %2037 = vmatprep.mubr.bf16.mxu1 %v2463_v28  ;;  %2085 = vmatprep.mubr.bf16.mxu0 %v2463_v28 }
  0x94   :  { %2038 = vmatmul.mubr.bf16.gmra.mrb[20].mxu1 %v2471_v37  ;;  %2086 = vmatmul.mubr.bf16.gmra.mrb[20].mxu0 %v2471_v37 }
  0x95   :  { %2041 = vmatprep.mubr.bf16.mxu1 %v2475_v44  ;;  %2089 = vmatprep.mubr.bf16.mxu0 %v2475_v44 }
  0x9c   :  { %2042 = vmatmul.mubr.bf16.gmra.mrb[24].mxu1 %v124_v53  ;;  %2090 = vmatmul.mubr.bf16.gmra.mrb[24].mxu0 %v124_v53 }
  0x9d   :  { %2045 = vmatprep.mubr.bf16.mxu1 %v125_v60  ;;  %2093 = vmatprep.mubr.bf16.mxu0 %v125_v60 }
  0xa4   :  { %2046 = vmatmul.mubr.bf16.gmra.mrb[28].mxu1 %v126_v4  ;;  %2094 = vmatmul.mubr.bf16.gmra.mrb[28].mxu0 %v126_v4 }
  0xa5   :  { %2049 = vmatprep.mubr.bf16.mxu1 %v2455_v9  ;;  %2097 = vmatprep.mubr.bf16.mxu0 %v2455_v9 }
  0xac   :  { %2050 = vmatmul.mubr.bf16.gmra.mrb[32].mxu1 %v2461_v23  ;;  %2098 = vmatmul.mubr.bf16.gmra.mrb[32].mxu0 %v2461_v23 }
  0xad   :  { %2053 = vmatprep.mubr.bf16.mxu1 %v2465_v29  ;;  %2101 = vmatprep.mubr.bf16.mxu0 %v2465_v29 }
  0xb4   :  { %2054 = vmatmul.mubr.bf16.gmra.mrb[36].mxu1 %v2473_v38  ;;  %2102 = vmatmul.mubr.bf16.gmra.mrb[36].mxu0 %v2473_v38 }
  0xb5   :  { %2057 = vmatprep.mubr.bf16.mxu1 %v2477_v45  ;;  %2105 = vmatprep.mubr.bf16.mxu0 %v2477_v45 }
  0xbc   :  { %2058 = vmatmul.mubr.bf16.gmra.mrb[40].mxu1 %v2483_v54  ;;  %2106 = vmatmul.mubr.bf16.gmra.mrb[40].mxu0 %v2483_v54 }
  0xbd   :  { %2061 = vmatprep.mubr.bf16.mxu1 %v133_v61  ;;  %2109 = vmatprep.mubr.bf16.mxu0 %v133_v61 }
  0xc4   :  { %2062 = vmatmul.mubr.bf16.gmra.mrb[44].mxu1 %v134_v5  ;;  %2110 = vmatmul.mubr.bf16.gmra.mrb[44].mxu0 %v134_v5 }
 0x13f   :  { %v1987_v9 = vpop.f32.mrb[0].mxu0  ;;  %v2003_v10 = vpop.f32.mrb[0].mxu1 }
 0x140   :  { %v249_v11 = vadd.f32 %v1987_v9, %v2511_v7  ;;  %v313_v12 = vadd.f32 %v2003_v10, %v2511_v7  ;;  %v240_v13 = vpop.f32.mrb[1].mxu0  ;;  %v304_v14 = vpop.f32.mrb[1].mxu1 }
 0x141   :  { %v241_v15 = vadd.f32 %v2511_v7, %v240_v13  ;;  %v305_v16 = vadd.f32 %v2511_v7, %v304_v14  ;;  %v1988_v17 = vpop.f32.mrb[2].mxu0  ;;  %v2004_v18 = vpop.f32.mrb[2].mxu1 }
 0x142   :  { %v833_v19 = vmul.f32 0.17677669, %v249_v11  ;;  %v252_v20 = vadd.f32 %v1988_v17, %v2511_v7  ;;  %v316_v21 = vadd.f32 %v2004_v18, %v2511_v7  ;;  %v243_v22 = vpop.f32.mrb[3].mxu0  ;;  %v307_v23 = vpop.f32.mrb[3].mxu1  ;;  %v849_v24 = vmul.f32 0.17677669, %v313_v12 }
 0x143   :  { %v244_v25 = vadd.f32 %v2511_v7, %v243_v22  ;;  %v308_v26 = vadd.f32 %v2511_v7, %v307_v23  ;;  %v831_v27 = vmul.f32 0.17677669, %v241_v15  ;;  %v847_v30 = vmul.f32 0.17677669, %v305_v16 }
 0x144   :  { %v834_v28 = vmul.f32 0.17677669, %v252_v20  ;;  %v850_v29 = vmul.f32 0.17677669, %v316_v21 }
 0x145   :  { %v832_v31 = vmul.f32 0.17677669, %v244_v25  ;;  %v848_v32 = vmul.f32 0.17677669, %v308_v26 }
 0x146   :  { %v1620_v33 = vpack.c.bf16 %v834_v28, %v833_v19  ;;  %v1660_v34 = vpack.c.bf16 %v850_v29, %v849_v24 }
 0x147   :  { %v1615_v35 = vpack.c.bf16 %v832_v31, %v831_v27  ;;  %v1655_v36 = vpack.c.bf16 %v848_v32, %v847_v30  ;;  %v1991_v37 = vpop.f32.mrb[4].mxu0  ;;  %v2007_v38 = vpop.f32.mrb[4].mxu1 }
 0x148   :  { %1852 = vst [vmem:[#allocation10 + $0x8] sm:$0xff] %v1620_v33   ;;  %1860 = vst [vmem:[#allocation10 + $0x48] sm:$0xff] %v1660_v34   ;;  %v265_v39 = vadd.f32 %v1991_v37, %v2511_v7  ;;  %v329_v40 = vadd.f32 %v2007_v38, %v2511_v7  ;;  %v256_v41 = vpop.f32.mrb[5].mxu0  ;;  %v320_v42 = vpop.f32.mrb[5].mxu1 }
 0x149   :  { %1616 = vst [vmem:[#allocation10] sm:$0xff] %v1615_v35   ;;  %1859 = vst [vmem:[#allocation10 + $0x40] sm:$0xff] %v1655_v36   ;;  %v257_v43 = vadd.f32 %v2511_v7, %v256_v41  ;;  %v321_v44 = vadd.f32 %v2511_v7, %v320_v42  ;;  %v1992_v45 = vpop.f32.mrb[6].mxu0  ;;  %v2008_v46 = vpop.f32.mrb[6].mxu1 }
 0x14a   :  { %v837_v47 = vmul.f32 0.17677669, %v265_v39  ;;  %v268_v48 = vadd.f32 %v1992_v45, %v2511_v7  ;;  %v332_v49 = vadd.f32 %v2008_v46, %v2511_v7  ;;  %v259_v50 = vpop.f32.mrb[7].mxu0  ;;  %v323_v51 = vpop.f32.mrb[7].mxu1  ;;  %v853_v52 = vmul.f32 0.17677669, %v329_v40 }
 0x14b   :  { %v260_v53 = vadd.f32 %v2511_v7, %v259_v50  ;;  %v324_v54 = vadd.f32 %v2511_v7, %v323_v51  ;;  %v835_v55 = vmul.f32 0.17677669, %v257_v43  ;;  %v851_v58 = vmul.f32 0.17677669, %v321_v44 }
 0x14c   :  { %v838_v56 = vmul.f32 0.17677669, %v268_v48  ;;  %v854_v57 = vmul.f32 0.17677669, %v332_v49  ;;  %v2548_v48 = vld [vmem:[%s2684_s6] ss:$0 sm:$0xff] }
 0x14d   :  { %v836_v59 = vmul.f32 0.17677669, %v260_v53  ;;  %v852_v60 = vmul.f32 0.17677669, %v324_v54 }
 0x14e   :  { %v1630_v61 = vpack.c.bf16 %v838_v56, %v837_v47  ;;  %v1670_v62 = vpack.c.bf16 %v854_v57, %v853_v52 }
 0x14f   :  { %v1625_v63 = vpack.c.bf16 %v836_v59, %v835_v55  ;;  %v1665_v0 = vpack.c.bf16 %v852_v60, %v851_v58  ;;  %v1995_v1 = vpop.f32.mrb[8].mxu0  ;;  %v2011_v2 = vpop.f32.mrb[8].mxu1 }
 0x150   :  { %1854 = vst [vmem:[#allocation10 + $0x18] sm:$0xff] %v1630_v61   ;;  %1862 = vst [vmem:[#allocation10 + $0x58] sm:$0xff] %v1670_v62   ;;  %v281_v3 = vadd.f32 %v1995_v1, %v2511_v7  ;;  %v345_v4 = vadd.f32 %v2011_v2, %v2511_v7  ;;  %v272_v5 = vpop.f32.mrb[9].mxu0  ;;  %v336_v6 = vpop.f32.mrb[9].mxu1 }
 0x151   :  { %1853 = vst [vmem:[#allocation10 + $0x10] sm:$0xff] %v1625_v63   ;;  %1861 = vst [vmem:[#allocation10 + $0x50] sm:$0xff] %v1665_v0   ;;  %v273_v8 = vadd.f32 %v2511_v7, %v272_v5  ;;  %v337_v9 = vadd.f32 %v2511_v7, %v336_v6  ;;  %v1996_v10 = vpop.f32.mrb[10].mxu0  ;;  %v2012_v11 = vpop.f32.mrb[10].mxu1 }
 0x152   :  { %v841_v12 = vmul.f32 0.17677669, %v281_v3  ;;  %v284_v13 = vadd.f32 %v1996_v10, %v2511_v7  ;;  %v348_v14 = vadd.f32 %v2012_v11, %v2511_v7  ;;  %v275_v15 = vpop.f32.mrb[11].mxu0  ;;  %v339_v16 = vpop.f32.mrb[11].mxu1  ;;  %v857_v17 = vmul.f32 0.17677669, %v345_v4 }
 0x153   :  { %v276_v18 = vadd.f32 %v2511_v7, %v275_v15  ;;  %v340_v19 = vadd.f32 %v2511_v7, %v339_v16  ;;  %v839_v20 = vmul.f32 0.17677669, %v273_v8  ;;  %v855_v23 = vmul.f32 0.17677669, %v337_v9 }
 0x154   :  { %v842_v21 = vmul.f32 0.17677669, %v284_v13  ;;  %v858_v22 = vmul.f32 0.17677669, %v348_v14 }
 0x155   :  { %v840_v24 = vmul.f32 0.17677669, %v276_v18  ;;  %v856_v25 = vmul.f32 0.17677669, %v340_v19 }
 0x156   :  { %v1640_v26 = vpack.c.bf16 %v842_v21, %v841_v12  ;;  %v1680_v27 = vpack.c.bf16 %v858_v22, %v857_v17 }
 0x157   :  { %v1635_v28 = vpack.c.bf16 %v840_v24, %v839_v20  ;;  %v1675_v29 = vpack.c.bf16 %v856_v25, %v855_v23  ;;  %v1999_v30 = vpop.f32.mrb[12].mxu0  ;;  %v2015_v31 = vpop.f32.mrb[12].mxu1 }
 0x158   :  { %1856 = vst [vmem:[#allocation10 + $0x28] sm:$0xff] %v1640_v26   ;;  %1864 = vst [vmem:[#allocation10 + $0x68] sm:$0xff] %v1680_v27   ;;  %v297_v32 = vadd.f32 %v1999_v30, %v2511_v7  ;;  %v361_v33 = vadd.f32 %v2015_v31, %v2511_v7  ;;  %v288_v34 = vpop.f32.mrb[13].mxu0  ;;  %v352_v35 = vpop.f32.mrb[13].mxu1 }
 0x159   :  { %1855 = vst [vmem:[#allocation10 + $0x20] sm:$0xff] %v1635_v28   ;;  %1863 = vst [vmem:[#allocation10 + $0x60] sm:$0xff] %v1675_v29   ;;  %v289_v36 = vadd.f32 %v2511_v7, %v288_v34  ;;  %v353_v37 = vadd.f32 %v2511_v7, %v352_v35  ;;  %v2000_v38 = vpop.f32.mrb[14].mxu0  ;;  %v2016_v39 = vpop.f32.mrb[14].mxu1 }
 0x15a   :  { %v845_v40 = vmul.f32 0.17677669, %v297_v32  ;;  %v300_v41 = vadd.f32 %v2000_v38, %v2511_v7  ;;  %v364_v42 = vadd.f32 %v2016_v39, %v2511_v7  ;;  %v291_v43 = vpop.f32.mrb[15].mxu0  ;;  %v355_v44 = vpop.f32.mrb[15].mxu1  ;;  %v861_v45 = vmul.f32 0.17677669, %v361_v33 }
 0x15b   :  { %v292_v46 = vadd.f32 %v2511_v7, %v291_v43  ;;  %v356_v47 = vadd.f32 %v2511_v7, %v355_v44  ;;  %v843_v49 = vmul.f32 0.17677669, %v289_v36  ;;  %v859_v52 = vmul.f32 0.17677669, %v353_v37  ;;  %v2553_v7 = vld [vmem:[%s2683_s5] ss:$0 sm:$0xff] }
 0x15c   :  { %v846_v50 = vmul.f32 0.17677669, %v300_v41  ;;  %v862_v51 = vmul.f32 0.17677669, %v364_v42  ;;  %s2252_s5 = scalar_lea.vmem %s2555_s22, 2048 }
 0x15d   :  { %v844_v53 = vmul.f32 0.17677669, %v292_v46  ;;  %v860_v54 = vmul.f32 0.17677669, %v356_v47  ;;  %p2253_p4 = scmp.ne.s32.totalorder %s2555_s22, %s2252_s5  ;;  %p2258_p6 = scmp.lt.s32.totalorder %s2252_s5, %s2252_s5 }
 0x15e   :  { %v1650_v55 = vpack.c.bf16 %v846_v50, %v845_v40  ;;  %v1690_v56 = vpack.c.bf16 %v862_v51, %v861_v45 }
 0x15f   :  { %v1645_v57 = vpack.c.bf16 %v844_v53, %v843_v49  ;;  %v1685_v58 = vpack.c.bf16 %v860_v54, %v859_v52  ;;  %v2035_v59 = vpop.f32.mrb[16].mxu1  ;;  %v2083_v60 = vpop.f32.mrb[16].mxu0  ;;  %p2259_p7 = por %p2258_p6, %p2257_p5 }
 0x160   :  { %1858 = vst [vmem:[#allocation10 + $0x38] sm:$0xff] %v1650_v55   ;;  %1866 = vst [vmem:[#allocation10 + $0x78] sm:$0xff] %v1690_v56   ;;  %v713_v61 = vadd.f32 %v2083_v60, %v2548_v48  ;;  %v472_v62 = vpop.f32.mrb[17].mxu1  ;;  %v704_v63 = vpop.f32.mrb[17].mxu0  ;;  %v481_v2 = vadd.f32 %v2035_v59, %v2553_v7 }
 0x161   :  { %1857 = vst [vmem:[#allocation10 + $0x30] sm:$0xff] %v1645_v57   ;;  %1865 = vst [vmem:[#allocation10 + $0x70] sm:$0xff] %v1685_v58   ;;  %v2036_v0 = vpop.f32.mrb[18].mxu1  ;;  %v2084_v1 = vpop.f32.mrb[18].mxu0  ;;  %p2260_p8 = pnand %p2259_p7, %p2253_p4 }
 0x162   :  { %v484_v3 = vadd.f32 %v2036_v0, %v2553_v7  ;;  %v716_v4 = vadd.f32 %v2084_v1, %v2548_v48  ;;  %v475_v5 = vpop.f32.mrb[19].mxu1  ;;  %v707_v6 = vpop.f32.mrb[19].mxu0 }
 0x163   :  { %2263 = shalt.err (!%p2260_p8)
}
 0x164   :  { %s2264_s27 = scalar_lea.hbm %s2685_s7, 2048 }
 0x165   :  { %p2265_p9 = scmp.ne.s32.totalorder %s2685_s7, %s2264_s27  ;;  %p2268_p10 = scmp.lt.u32.totalorder %s2264_s27, %s2685_s7 }
 0x167   :  { %p2270_p11 = pnand %p2268_p10, %p2265_p9 }
 0x169   :  { %2273 = shalt.err (!%p2270_p11)
}
 0x16a   :  { %1354 = dma.vmem_to_hbm [thread:$0]  %s2555_s22, 2048, %s2685_s7, [#allocation4], %s2329_s19, %s2329_s19, %s2330_s20   ;;  %v473_v8 = vadd.f32 %v2553_v7, %v472_v62  ;;  %v705_v9 = vadd.f32 %v2548_v48, %v704_v63  ;;  %v476_v10 = vadd.f32 %v2553_v7, %v475_v5  ;;  %v708_v11 = vadd.f32 %v2548_v48, %v707_v6  ;;  %v2039_v16 = vpop.f32.mrb[20].mxu1  ;;  %v2087_v17 = vpop.f32.mrb[20].mxu0 }
 0x16b   :  { %v1700_v12 = vpack.c.bf16 %v484_v3, %v481_v2  ;;  %v1780_v13 = vpack.c.bf16 %v716_v4, %v713_v61  ;;  %v729_v18 = vadd.f32 %v2087_v17, %v2548_v48  ;;  %v488_v19 = vpop.f32.mrb[21].mxu1  ;;  %v720_v20 = vpop.f32.mrb[21].mxu0  ;;  %v497_v23 = vadd.f32 %v2039_v16, %v2553_v7  ;;  %s2337_s7 = smov [#allocation11]   ;;  %s2338_s1 = smov [#allocation13]  }
 0x16c   :  { %v1695_v14 = vpack.c.bf16 %v476_v10, %v473_v8  ;;  %v1775_v15 = vpack.c.bf16 %v708_v11, %v705_v9  ;;  %v2040_v21 = vpop.f32.mrb[22].mxu1  ;;  %v2088_v22 = vpop.f32.mrb[22].mxu0  ;;  %v489_v28 = vadd.f32 %v2553_v7, %v488_v19  ;;  %v721_v29 = vadd.f32 %v2548_v48, %v720_v20  ;;  %s1360_s12 = sshll.u32 %s2337_s7, 4  ;;  %s1372_s10 = sshll.u32 %s2338_s1, 4  ;;  %s1361_s12 = int_to_ptr.vmem [resolvable:$true] %s1360_s12  ;;  %s2641_s10 = int_to_ptr.vmem [resolvable:$true] %s1372_s10 }
 0x16d   :  { %1867 = vst [vmem:[#allocation11 + $0x8] sm:$0xff] %v1700_v12   ;;  %1882 = vst [vmem:[#allocation13 + $0x8] sm:$0xff] %v1780_v13   ;;  %v500_v24 = vadd.f32 %v2040_v21, %v2553_v7  ;;  %v732_v25 = vadd.f32 %v2088_v22, %v2548_v48  ;;  %v491_v26 = vpop.f32.mrb[23].mxu1  ;;  %v723_v27 = vpop.f32.mrb[23].mxu0  ;;  %s2274_s13 = scalar_lea.vmem %s1361_s12, 2048  ;;  %p2279_p13 = scmp.lt.s32.totalorder %s1361_s12, %s1361_s12 }
 0x16e   :  { %1696 = vst [vmem:[#allocation11] sm:$0xff] %v1695_v14   ;;  %1776 = vst [vmem:[#allocation13] sm:$0xff] %v1775_v15   ;;  %v492_v30 = vadd.f32 %v2553_v7, %v491_v26  ;;  %v724_v31 = vadd.f32 %v2548_v48, %v723_v27  ;;  %p2275_p12 = scmp.ne.s32.totalorder %s1361_s12, %s2274_s13  ;;  %p2280_p0 = scmp.lt.s32.totalorder %s2274_s13, %s2274_s13 }
 0x16f   :  { %v1710_v32 = vpack.c.bf16 %v500_v24, %v497_v23  ;;  %v1790_v33 = vpack.c.bf16 %v732_v25, %v729_v18  ;;  %v2043_v36 = vpop.f32.mrb[24].mxu1  ;;  %v2091_v37 = vpop.f32.mrb[24].mxu0 }
 0x170   :  { %v1705_v34 = vpack.c.bf16 %v492_v30, %v489_v28  ;;  %v1785_v35 = vpack.c.bf16 %v724_v31, %v721_v29  ;;  %v745_v38 = vadd.f32 %v2091_v37, %v2548_v48  ;;  %v504_v39 = vpop.f32.mrb[25].mxu1  ;;  %v736_v40 = vpop.f32.mrb[25].mxu0  ;;  %v513_v43 = vadd.f32 %v2043_v36, %v2553_v7  ;;  %p2281_p1 = por %p2280_p0, %p2279_p13 }
 0x171   :  { %1869 = vst [vmem:[#allocation11 + $0x18] sm:$0xff] %v1710_v32   ;;  %1884 = vst [vmem:[#allocation13 + $0x18] sm:$0xff] %v1790_v33   ;;  %v2044_v41 = vpop.f32.mrb[26].mxu1  ;;  %v2092_v42 = vpop.f32.mrb[26].mxu0  ;;  %v505_v49 = vadd.f32 %v2553_v7, %v504_v39  ;;  %v737_v50 = vadd.f32 %v2548_v48, %v736_v40 }
 0x172   :  { %1868 = vst [vmem:[#allocation11 + $0x10] sm:$0xff] %v1705_v34   ;;  %1883 = vst [vmem:[#allocation13 + $0x10] sm:$0xff] %v1785_v35   ;;  %v516_v44 = vadd.f32 %v2044_v41, %v2553_v7  ;;  %v748_v45 = vadd.f32 %v2092_v42, %v2548_v48  ;;  %v507_v46 = vpop.f32.mrb[27].mxu1  ;;  %v739_v47 = vpop.f32.mrb[27].mxu0  ;;  %p2282_p2 = pnand %p2281_p1, %p2275_p12 }
 0x173   :  { %v508_v51 = vadd.f32 %v2553_v7, %v507_v46  ;;  %v740_v52 = vadd.f32 %v2548_v48, %v739_v47 }
 0x174   :  { %v1720_v53 = vpack.c.bf16 %v516_v44, %v513_v43  ;;  %v1800_v54 = vpack.c.bf16 %v748_v45, %v745_v38 }
 0x175   :  { %v1715_v55 = vpack.c.bf16 %v508_v51, %v505_v49  ;;  %v1795_v56 = vpack.c.bf16 %v740_v52, %v737_v50 }
 0x176   :  { %1871 = vst [vmem:[#allocation11 + $0x28] sm:$0xff] %v1720_v53   ;;  %1886 = vst [vmem:[#allocation13 + $0x28] sm:$0xff] %v1800_v54  }
 0x177   :  { %1870 = vst [vmem:[#allocation11 + $0x20] sm:$0xff] %v1715_v55   ;;  %1885 = vst [vmem:[#allocation13 + $0x20] sm:$0xff] %v1795_v56   ;;  %v2047_v57 = vpop.f32.mrb[28].mxu1  ;;  %v2095_v58 = vpop.f32.mrb[28].mxu0 }
 0x178   :  { %v761_v59 = vadd.f32 %v2095_v58, %v2548_v48  ;;  %v520_v60 = vpop.f32.mrb[29].mxu1  ;;  %v752_v61 = vpop.f32.mrb[29].mxu0  ;;  %v529_v0 = vadd.f32 %v2047_v57, %v2553_v7 }
 0x179   :  { %v2048_v62 = vpop.f32.mrb[30].mxu1  ;;  %v2096_v63 = vpop.f32.mrb[30].mxu0  ;;  %v521_v5 = vadd.f32 %v2553_v7, %v520_v60  ;;  %v753_v6 = vadd.f32 %v2548_v48, %v752_v61 }
 0x17a   :  { %v532_v1 = vadd.f32 %v2048_v62, %v2553_v7  ;;  %v764_v2 = vadd.f32 %v2096_v63, %v2548_v48  ;;  %v523_v3 = vpop.f32.mrb[31].mxu1  ;;  %v755_v4 = vpop.f32.mrb[31].mxu0 }
 0x17b   :  { %v524_v8 = vadd.f32 %v2553_v7, %v523_v3  ;;  %v756_v9 = vadd.f32 %v2548_v48, %v755_v4 }
 0x17c   :  { %v1730_v10 = vpack.c.bf16 %v532_v1, %v529_v0  ;;  %v1810_v11 = vpack.c.bf16 %v764_v2, %v761_v59 }
 0x17d   :  { %v1725_v12 = vpack.c.bf16 %v524_v8, %v521_v5  ;;  %v1805_v13 = vpack.c.bf16 %v756_v9, %v753_v6 }
 0x17e   :  { %1873 = vst [vmem:[#allocation11 + $0x38] sm:$0xff] %v1730_v10   ;;  %1888 = vst [vmem:[#allocation13 + $0x38] sm:$0xff] %v1810_v11  }
 0x17f   :  { %1872 = vst [vmem:[#allocation11 + $0x30] sm:$0xff] %v1725_v12   ;;  %1887 = vst [vmem:[#allocation13 + $0x30] sm:$0xff] %v1805_v13   ;;  %v2051_v14 = vpop.f32.mrb[32].mxu1  ;;  %v2099_v15 = vpop.f32.mrb[32].mxu0 }
 0x180   :  { %v777_v16 = vadd.f32 %v2099_v15, %v2548_v48  ;;  %v536_v17 = vpop.f32.mrb[33].mxu1  ;;  %v768_v18 = vpop.f32.mrb[33].mxu0  ;;  %v545_v21 = vadd.f32 %v2051_v14, %v2553_v7 }
 0x181   :  { %v2052_v19 = vpop.f32.mrb[34].mxu1  ;;  %v2100_v20 = vpop.f32.mrb[34].mxu0  ;;  %v537_v26 = vadd.f32 %v2553_v7, %v536_v17  ;;  %v769_v27 = vadd.f32 %v2548_v48, %v768_v18 }
 0x182   :  { %v548_v22 = vadd.f32 %v2052_v19, %v2553_v7  ;;  %v780_v23 = vadd.f32 %v2100_v20, %v2548_v48  ;;  %v539_v24 = vpop.f32.mrb[35].mxu1  ;;  %v771_v25 = vpop.f32.mrb[35].mxu0 }
 0x183   :  { %v540_v28 = vadd.f32 %v2553_v7, %v539_v24  ;;  %v772_v29 = vadd.f32 %v2548_v48, %v771_v25 }
 0x184   :  { %v1740_v30 = vpack.c.bf16 %v548_v22, %v545_v21  ;;  %v1820_v31 = vpack.c.bf16 %v780_v23, %v777_v16 }
 0x185   :  { %v1735_v32 = vpack.c.bf16 %v540_v28, %v537_v26  ;;  %v1815_v33 = vpack.c.bf16 %v772_v29, %v769_v27 }
 0x186   :  { %1875 = vst [vmem:[#allocation11 + $0x48] sm:$0xff] %v1740_v30   ;;  %1890 = vst [vmem:[#allocation13 + $0x48] sm:$0xff] %v1820_v31  }
 0x187   :  { %1874 = vst [vmem:[#allocation11 + $0x40] sm:$0xff] %v1735_v32   ;;  %1889 = vst [vmem:[#allocation13 + $0x40] sm:$0xff] %v1815_v33   ;;  %v2055_v34 = vpop.f32.mrb[36].mxu1  ;;  %v2103_v35 = vpop.f32.mrb[36].mxu0 }
 0x188   :  { %v793_v36 = vadd.f32 %v2103_v35, %v2548_v48  ;;  %v552_v37 = vpop.f32.mrb[37].mxu1  ;;  %v784_v38 = vpop.f32.mrb[37].mxu0  ;;  %v561_v41 = vadd.f32 %v2055_v34, %v2553_v7 }
 0x189   :  { %v2056_v39 = vpop.f32.mrb[38].mxu1  ;;  %v2104_v40 = vpop.f32.mrb[38].mxu0  ;;  %v553_v46 = vadd.f32 %v2553_v7, %v552_v37  ;;  %v785_v47 = vadd.f32 %v2548_v48, %v784_v38 }
 0x18a   :  { %v564_v42 = vadd.f32 %v2056_v39, %v2553_v7  ;;  %v796_v43 = vadd.f32 %v2104_v40, %v2548_v48  ;;  %v555_v44 = vpop.f32.mrb[39].mxu1  ;;  %v787_v45 = vpop.f32.mrb[39].mxu0 }
 0x18b   :  { %v556_v49 = vadd.f32 %v2553_v7, %v555_v44  ;;  %v788_v50 = vadd.f32 %v2548_v48, %v787_v45 }
 0x18c   :  { %v1750_v51 = vpack.c.bf16 %v564_v42, %v561_v41  ;;  %v1830_v52 = vpack.c.bf16 %v796_v43, %v793_v36 }
 0x18d   :  { %v1745_v53 = vpack.c.bf16 %v556_v49, %v553_v46  ;;  %v1825_v54 = vpack.c.bf16 %v788_v50, %v785_v47 }
 0x18e   :  { %1877 = vst [vmem:[#allocation11 + $0x58] sm:$0xff] %v1750_v51   ;;  %1892 = vst [vmem:[#allocation13 + $0x58] sm:$0xff] %v1830_v52  }
 0x18f   :  { %1876 = vst [vmem:[#allocation11 + $0x50] sm:$0xff] %v1745_v53   ;;  %1891 = vst [vmem:[#allocation13 + $0x50] sm:$0xff] %v1825_v54   ;;  %v2059_v55 = vpop.f32.mrb[40].mxu1  ;;  %v2107_v56 = vpop.f32.mrb[40].mxu0 }
 0x190   :  { %v809_v57 = vadd.f32 %v2107_v56, %v2548_v48  ;;  %v568_v58 = vpop.f32.mrb[41].mxu1  ;;  %v800_v59 = vpop.f32.mrb[41].mxu0  ;;  %v577_v62 = vadd.f32 %v2059_v55, %v2553_v7 }
 0x191   :  { %v2060_v60 = vpop.f32.mrb[42].mxu1  ;;  %v2108_v61 = vpop.f32.mrb[42].mxu0  ;;  %v569_v3 = vadd.f32 %v2553_v7, %v568_v58  ;;  %v801_v4 = vadd.f32 %v2548_v48, %v800_v59 }
 0x192   :  { %v580_v63 = vadd.f32 %v2060_v60, %v2553_v7  ;;  %v812_v0 = vadd.f32 %v2108_v61, %v2548_v48  ;;  %v571_v1 = vpop.f32.mrb[43].mxu1  ;;  %v803_v2 = vpop.f32.mrb[43].mxu0 }
 0x193   :  { %v572_v5 = vadd.f32 %v2553_v7, %v571_v1  ;;  %v804_v6 = vadd.f32 %v2548_v48, %v803_v2 }
 0x194   :  { %v1760_v8 = vpack.c.bf16 %v580_v63, %v577_v62  ;;  %v1840_v9 = vpack.c.bf16 %v812_v0, %v809_v57 }
 0x195   :  { %v1755_v10 = vpack.c.bf16 %v572_v5, %v569_v3  ;;  %v1835_v11 = vpack.c.bf16 %v804_v6, %v801_v4 }
 0x196   :  { %1879 = vst [vmem:[#allocation11 + $0x68] sm:$0xff] %v1760_v8   ;;  %1894 = vst [vmem:[#allocation13 + $0x68] sm:$0xff] %v1840_v9  }
 0x197   :  { %1878 = vst [vmem:[#allocation11 + $0x60] sm:$0xff] %v1755_v10   ;;  %1893 = vst [vmem:[#allocation13 + $0x60] sm:$0xff] %v1835_v11   ;;  %v2063_v12 = vpop.f32.mrb[44].mxu1  ;;  %v2111_v13 = vpop.f32.mrb[44].mxu0 }
 0x198   :  { %v825_v14 = vadd.f32 %v2111_v13, %v2548_v48  ;;  %v584_v15 = vpop.f32.mrb[45].mxu1  ;;  %v816_v16 = vpop.f32.mrb[45].mxu0  ;;  %v593_v19 = vadd.f32 %v2063_v12, %v2553_v7 }
 0x199   :  { %v2064_v17 = vpop.f32.mrb[46].mxu1  ;;  %v2112_v18 = vpop.f32.mrb[46].mxu0  ;;  %v585_v24 = vadd.f32 %v2553_v7, %v584_v15  ;;  %v817_v25 = vadd.f32 %v2548_v48, %v816_v16 }
 0x19a   :  { %v596_v20 = vadd.f32 %v2064_v17, %v2553_v7  ;;  %v828_v21 = vadd.f32 %v2112_v18, %v2548_v48  ;;  %v587_v22 = vpop.f32.mrb[47].mxu1  ;;  %v819_v23 = vpop.f32.mrb[47].mxu0 }
 0x19b   :  { %v588_v26 = vadd.f32 %v2553_v7, %v587_v22  ;;  %v820_v27 = vadd.f32 %v2548_v48, %v819_v23 }
 0x19c   :  { %v1770_v28 = vpack.c.bf16 %v596_v20, %v593_v19  ;;  %v1850_v29 = vpack.c.bf16 %v828_v21, %v825_v14 }
 0x19d   :  { %v1765_v30 = vpack.c.bf16 %v588_v26, %v585_v24  ;;  %v1845_v31 = vpack.c.bf16 %v820_v27, %v817_v25 }
 0x19e   :  { %1881 = vst [vmem:[#allocation11 + $0x78] sm:$0xff] %v1770_v28   ;;  %1896 = vst [vmem:[#allocation13 + $0x78] sm:$0xff] %v1850_v29  }
 0x19f   :  { %1880 = vst [vmem:[#allocation11 + $0x70] sm:$0xff] %v1765_v30   ;;  %1895 = vst [vmem:[#allocation13 + $0x70] sm:$0xff] %v1845_v31  }
 0x1a0   :  { %2285 = shalt.err (!%p2282_p2)
}
 0x1a1   :  { %s2286_s2 = scalar_lea.hbm %s2686_s8, 2048 }
 0x1a2   :  { %p2287_p3 = scmp.ne.s32.totalorder %s2686_s8, %s2286_s2  ;;  %p2290_p4 = scmp.lt.u32.totalorder %s2286_s2, %s2686_s8 }
 0x1a4   :  { %p2292_p5 = pnand %p2290_p4, %p2287_p3 }
 0x1a6   :  { %2295 = shalt.err (!%p2292_p5)
}
 0x1a7   :  { %1366 = dma.vmem_to_hbm [thread:$0]  %s1361_s12, 2048, %s2686_s8, [#allocation12], %s2329_s19, %s2329_s19, %s2330_s20  }
 0x1a8   :  { %s2296_s22 = scalar_lea.vmem %s2641_s10, 2048  ;;  %p2301_p7 = scmp.lt.s32.totalorder %s2641_s10, %s2641_s10 }
 0x1a9   :  { %p2297_p6 = scmp.ne.s32.totalorder %s2641_s10, %s2296_s22  ;;  %p2302_p8 = scmp.lt.s32.totalorder %s2296_s22, %s2296_s22 }
 0x1ab   :  { %p2303_p9 = por %p2302_p8, %p2301_p7 }
 0x1ad   :  { %p2304_p10 = pnand %p2303_p9, %p2297_p6 }
 0x1af   :  { %2307 = shalt.err (!%p2304_p10)
}
 0x1b0   :  { %s2308_s5 = scalar_lea.hbm %s2687_s9, 2048 }
 0x1b1   :  { %p2309_p11 = scmp.ne.s32.totalorder %s2687_s9, %s2308_s5  ;;  %p2312_p12 = scmp.lt.u32.totalorder %s2308_s5, %s2687_s9 }
 0x1b3   :  { %p2314_p13 = pnand %p2312_p12, %p2309_p11 }
 0x1b5   :  { %2317 = shalt.err (!%p2314_p13)
}
 0x1b6   :  { %1378 = dma.vmem_to_hbm [thread:$0]  %s2641_s10, 2048, %s2687_s9, [#allocation12], %s2329_s19, %s2329_s19, %s2330_s20  }
 0x1b7   :  { %2324 = dma.done.wait [#allocation4], 2048  }
 0x1b8   :  { %2325 = vsyncadd [#allocation4], 4294965248 }
 0x1b9   :  { %2326 = dma.done.wait [#allocation12], 4096  }
 0x1ba   :  { %2327 = vsyncadd [#allocation12], 4294963200 }
 0x1bb   :  { %1388 = vsyncpa [#allocation3], 1 }
 0x1bc   :  { %1389 = vsyncpa [#allocation6], 1 }
 0x1bd   :  { %1390 = vsyncpa [#allocation9], 1 }
 0x1be   :  { %1391 = vsyncpa [#allocation4], 1 }
 0x1bf   :  { %1392 = vsyncpa [#allocation12], 1 }

</bundles_post_ra>
